<compile_context>
chip_gen: v5e
topology: v5e:2x2
jax: 0.10.0
libtpu: 0.0.40
codegen_flags: <defaults>
</compile_context>

<pallas_src>
import functools
import numpy as np
import jax
import jax.numpy as jnp
from jax.experimental import pallas as pl
from jax.experimental.pallas import tpu as pltpu

LANE = 128
SUB = 16            # bf16 sublane packing -> keep batch tiles a multiple of 16


def _round_up(n: int, m: int) -> int:
    return (n + m - 1) // m * m


# ----------------------------------------------------------------------------
# Kernel
# ----------------------------------------------------------------------------
def _deepfm_kernel(x_ref, wexp_ref, w1_ref, b1_ref, w2_ref, bout_ref, o_ref,
                   *, num_fields, field_size):
    F, D = num_fields, field_size
    xf = x_ref[...]                                     # (TB, F*D) bf16, lane-dense

    # ---- MLP branch (single hidden layer, eval-mode dropout) -----------------
    h = jnp.dot(xf, w1_ref[...],
                preferred_element_type=jnp.float32) + b1_ref[...]
    h = jnp.maximum(h, 0.0).astype(w2_ref.dtype)        # ReLU, back to bf16
    # bout already holds b_mlp_out + b_fm (folded on the host).
    acc = jnp.dot(h, w2_ref[...],
                  preferred_element_type=jnp.float32) + bout_ref[...]

    # ---- FM branch: per-field lane-dense accumulation -------------------------
    # pair products for field f:  tile(x[:, f, :], F) * x_flat  -> (TB, F*D)
    # weight block Wexp[f][(g,d), o] = W_fm[o, pair(f,g)]  (zero unless g > f),
    # so each step is one lane-dense (TB, F*D) @ (F*D, OUT_pad) MXU call — no
    # (TB, F*F*D) temporaries, no relayout.  The f = F-1 block is all zeros
    # and was dropped on the host.
    # TODO(synk): on v5e (197 TF/s MXU) a strict-upper-only Wexp (K = P*D)
    # would halve FM MXU time; unnecessary on v6e/v7x.
    for f in range(F - 1):
        x_f = xf[:, f * D:(f + 1) * D]                  # (TB, D)
        y_pair = jnp.tile(x_f, (1, F)) * xf             # (TB, F*D) bf16
        acc = acc + jnp.dot(y_pair, wexp_ref[f],
                            preferred_element_type=jnp.float32)

    o_ref[...] = acc.astype(o_ref.dtype)                # (TB, OUT_pad) bf16


# ----------------------------------------------------------------------------
# Host-side parameter preparation (done once, outside the per-call path)
# ----------------------------------------------------------------------------
def prepare_deepfm_params(w_fm, b_fm, w1, b1, w2, b2, *, num_fields, field_size,
                          compute_dtype=jnp.bfloat16):
    """Torch-convention weights: w_fm (OUT, P), w1 (H, F*D), w2 (OUT, H)."""
    F, D = num_fields, field_size
    out_size = int(w_fm.shape[0])
    hidden = int(w1.shape[0])
    out_p = _round_up(out_size, LANE)
    hid_p = _round_up(hidden, LANE)

    # Fold the triu-gather + Linear into a dense per-field weight stack.
    # np.triu_indices(k=1) enumerates pairs row-major, same order as
    # torch.triu_indices(F, F, 1).  The f = F-1 block is all zeros -> dropped.
    iu, ju = np.triu_indices(F, k=1)
    wsel = np.zeros((F, F, out_p), np.float32)
    wsel[iu, ju, :out_size] = np.asarray(w_fm, np.float32).T            # (P, OUT)
    wexp = np.broadcast_to(wsel[:F - 1, :, None, :], (F - 1, F, D, out_p))
    wexp = np.ascontiguousarray(wexp).reshape(F - 1, F * D, out_p)

    def pad_row(v, cols):
        buf = np.zeros((1, cols), np.float32)
        v = np.asarray(v, np.float32).reshape(-1)
        buf[0, :v.shape[0]] = v
        return buf

    def pad2(a, rows, cols):
        buf = np.zeros((rows, cols), np.float32)
        a = np.asarray(a, np.float32)
        buf[:a.shape[0], :a.shape[1]] = a
        return buf

    return dict(
        wexp=jnp.asarray(wexp, compute_dtype),                           # (F-1, FD, OUTp)
        w1=jnp.asarray(pad2(np.asarray(w1).T, F * D, hid_p), compute_dtype),
        b1=jnp.asarray(pad_row(b1, hid_p), jnp.float32),
        w2=jnp.asarray(pad2(np.asarray(w2).T, hid_p, out_p), compute_dtype),
        b_out=jnp.asarray(pad_row(b_fm, out_p) + pad_row(b2, out_p), jnp.float32),
        meta=dict(num_fields=F, field_size=D, out_size=out_size,
                  out_pad=out_p, hid_pad=hid_p),
    )


# ----------------------------------------------------------------------------
# Forward wrapper
# ----------------------------------------------------------------------------
def _vmem_bytes(tb, FD, k_fm, hid_p, out_p):
    bf = 2
    act = 2 * tb * FD * bf                              # x tile (double-buffered)
    out = 2 * tb * out_p * bf                           # bf16 output tile (double-buffered)
    wts = 2 * (k_fm * out_p + FD * hid_p + hid_p * out_p) * bf   # weights (2 bufs)
    wts += 2 * (hid_p + out_p) * 4                      # biases f32
    tmp = 8 * tb * max(FD, hid_p, out_p) * 4            # rough in-kernel f32 temporaries
    return act + out + wts + tmp


_VMEM_BUDGET = 40 << 20        # conservative vs v7x's 64 MiB physical VMEM


def deepfm_forward(x, params, *, block_b=1024, compute_dtype=jnp.bfloat16):
    meta = params["meta"]
    F, D = meta["num_fields"], meta["field_size"]
    out_size, out_p, hid_p = meta["out_size"], meta["out_pad"], meta["hid_pad"]
    B = x.shape[0]
    FD = F * D
    k_fm = (F - 1) * FD

    # Batch tile: multiple of 16 (bf16 sublane packing), chosen so the grid has
    # >= 2 steps when B allows (v7x megacore sharding of the "parallel" axis),
    # and shrunk until the double-buffered footprint fits the VMEM budget.
    tb = max(SUB, min(_round_up(block_b, SUB), _round_up((B + 1) // 2, SUB)))
    while tb > SUB and _vmem_bytes(tb, FD, k_fm, hid_p, out_p) > _VMEM_BUDGET:
        tb = max(SUB, _round_up(tb // 2, SUB))
    b_pad = _round_up(B, tb)

    x_flat = x.reshape(B, FD).astype(compute_dtype)     # single lane-dense stream
    if b_pad != B:
        x_flat = jnp.pad(x_flat, ((0, b_pad - B), (0, 0)))

    vmem_limit = int(min(max(2 * _vmem_bytes(tb, FD, k_fm, hid_p, out_p),
                             32 << 20), 48 << 20))

    resident = lambda i: (0, 0)                         # weights stay VMEM-resident
    resident3 = lambda i: (0, 0, 0)
    kernel = functools.partial(_deepfm_kernel, num_fields=F, field_size=D)

    out = pl.pallas_call(
        kernel,
        out_shape=jax.ShapeDtypeStruct((b_pad, out_p), jnp.bfloat16),
        grid_spec=pltpu.PrefetchScalarGridSpec(
            num_scalar_prefetch=0,
            grid=(b_pad // tb,),
            in_specs=[
                pl.BlockSpec((tb, FD), lambda i: (i, 0)),        # activations
                # Constant index_map -> fetched once and kept VMEM-resident.
                # (pipeline_mode=pl.Buffered(1) would halve their VMEM
                # footprint; only worth it at much larger F.)
                pl.BlockSpec((F - 1, FD, out_p), resident3),     # wexp (FM)
                pl.BlockSpec((FD, hid_p), resident),             # w1
                pl.BlockSpec((1, hid_p), resident),              # b1
                pl.BlockSpec((hid_p, out_p), resident),          # w2
                pl.BlockSpec((1, out_p), resident),              # b_fm + b2
            ],
            out_specs=pl.BlockSpec((tb, out_p), lambda i: (i, 0)),
        ),
        compiler_params=pltpu.CompilerParams(
            dimension_semantics=("parallel",),
            vmem_limit_bytes=vmem_limit),
    )(x_flat, params["wexp"], params["w1"], params["b1"], params["w2"],
      params["b_out"])

    # NOTE: for large B, prefer consuming the padded bf16 buffer directly in
    # the caller's fusion instead of paying this extra slicing pass.
    return out[:B, :out_size]


# ----------------------------------------------------------------------------
# Pure-JAX reference (f32, explicit triu gather) — mirrors the PyTorch forward
# ----------------------------------------------------------------------------
def deepfm_reference(x, w_fm, b_fm, w1, b1, w2, b2):
    B, F, D = x.shape
    inter = jnp.einsum('bfd,bgd->bfg', x, x)
    iu, ju = np.triu_indices(F, k=1)
    fm_feat = inter[:, iu, ju]                          # (B, P)
    y_fm = fm_feat @ w_fm.T + b_fm
    h = jnp.maximum(x.reshape(B, -1) @ w1.T + b1, 0.0)
    y_mlp = h @ w2.T + b2
    return y_fm + y_mlp


if __name__ == "__main__":
    B, F, D = 8, 8, 16          # batch, num_fields, field_size  (F*D = 128)
    H, OUT = 32, 4              # mlp hidden size, out_size
    P = F * (F - 1) // 2        # fm.out_size

    key = jax.random.PRNGKey(0)
    kx, k0, k1, k2, k3, k4, k5 = jax.random.split(key, 7)

    x    = jax.random.normal(kx, (B, F, D), jnp.float32)
    w_fm = 0.1 * jax.random.normal(k0, (OUT, P), jnp.float32)
    b_fm = 0.1 * jax.random.normal(k1, (OUT,), jnp.float32)
    w1   = 0.1 * jax.random.normal(k2, (H, F * D), jnp.float32)
    b1   = 0.1 * jax.random.normal(k3, (H,), jnp.float32)
    w2   = 0.1 * jax.random.normal(k4, (OUT, H), jnp.float32)
    b2   = 0.1 * jax.random.normal(k5, (OUT,), jnp.float32)

    params = prepare_deepfm_params(w_fm, b_fm, w1, b1, w2, b2,
                                   num_fields=F, field_size=D)
    y = deepfm_forward(x, params)
    y = jax.block_until_ready(y)

    y_ref = deepfm_reference(x, w_fm, b_fm, w1, b1, w2, b2)
    # bf16 activations/weights/output with f32 accumulation -> bf16 tolerance.
    np.testing.assert_allclose(np.asarray(y.astype(jnp.float32)),
                               np.asarray(y_ref), rtol=5e-2, atol=5e-2)

    print("KERNEL_OK")
</pallas_src>

<mosaic_0001>
module attributes {stable_mosaic.version = 11 : i64} {
  func.func @_deepfm_kernel(%arg0: i32, %arg1: memref<16x128xbf16, #tpu.memory_space<vmem>>, %arg2: memref<7x128x128xbf16, #tpu.memory_space<vmem>>, %arg3: memref<128x128xbf16, #tpu.memory_space<vmem>>, %arg4: memref<1x128xf32, #tpu.memory_space<vmem>>, %arg5: memref<128x128xbf16, #tpu.memory_space<vmem>>, %arg6: memref<1x128xf32, #tpu.memory_space<vmem>>, %arg7: memref<16x128xbf16, #tpu.memory_space<vmem>>) attributes {dimension_semantics = [#tpu.dimension_semantics<parallel>], iteration_bounds = array<i64: 1>, scalar_prefetch = 0 : i64, scratch_operands = 0 : i64, tpu.core_type = #tpu.core_type<tc>, window_params = [{transform_indices = @transform_0, window_bounds = array<i64: 16, 128>}, {pipeline_mode = #tpu.pipeline_mode<synchronous>, transform_indices = @transform_1, window_bounds = array<i64: 7, 128, 128>}, {pipeline_mode = #tpu.pipeline_mode<synchronous>, transform_indices = @transform_2, window_bounds = array<i64: 128, 128>}, {pipeline_mode = #tpu.pipeline_mode<synchronous>, transform_indices = @transform_3, window_bounds = array<i64: 1, 128>}, {pipeline_mode = #tpu.pipeline_mode<synchronous>, transform_indices = @transform_4, window_bounds = array<i64: 128, 128>}, {pipeline_mode = #tpu.pipeline_mode<synchronous>, transform_indices = @transform_5, window_bounds = array<i64: 1, 128>}, {transform_indices = @transform_6, window_bounds = array<i64: 16, 128>}]} {
    %c0 = arith.constant 0 : index
    %c0_0 = arith.constant 0 : index
    %0 = vector.load %arg1[%c0, %c0_0] : memref<16x128xbf16, #tpu.memory_space<vmem>>, vector<16x128xbf16>
    %c0_1 = arith.constant 0 : index
    %c0_2 = arith.constant 0 : index
    %1 = vector.load %arg3[%c0_1, %c0_2] : memref<128x128xbf16, #tpu.memory_space<vmem>>, vector<128x128xbf16>
    %cst = arith.constant dense<0.000000e+00> : vector<16x128xf32>
    %2 = tpu.matmul %0, %1, %cst {dimension_numbers = #tpu.dot_dimension_numbers<[1], [0], [0], [1], [0, 0, 1, 1], [], []>} : vector<16x128xbf16>, vector<128x128xbf16>, vector<16x128xf32> -> vector<16x128xf32>
    %c0_3 = arith.constant 0 : index
    %c0_4 = arith.constant 0 : index
    %3 = vector.load %arg4[%c0_3, %c0_4] : memref<1x128xf32, #tpu.memory_space<vmem>>, vector<1x128xf32>
    %4 = vector.broadcast %3 : vector<1x128xf32> to vector<16x128xf32>
    %5 = arith.addf %2, %4 : vector<16x128xf32>
    %cst_5 = arith.constant 0.000000e+00 : f32
    %6 = vector.broadcast %cst_5 : f32 to vector<16x128xf32>
    %7 = arith.maximumf %5, %6 : vector<16x128xf32>
    %8 = arith.truncf %7 : vector<16x128xf32> to vector<16x128xbf16>
    %c0_6 = arith.constant 0 : index
    %c0_7 = arith.constant 0 : index
    %9 = vector.load %arg5[%c0_6, %c0_7] : memref<128x128xbf16, #tpu.memory_space<vmem>>, vector<128x128xbf16>
    %cst_8 = arith.constant dense<0.000000e+00> : vector<16x128xf32>
    %10 = tpu.matmul %8, %9, %cst_8 {dimension_numbers = #tpu.dot_dimension_numbers<[1], [0], [0], [1], [0, 0, 1, 1], [], []>} : vector<16x128xbf16>, vector<128x128xbf16>, vector<16x128xf32> -> vector<16x128xf32>
    %c0_9 = arith.constant 0 : index
    %c0_10 = arith.constant 0 : index
    %11 = vector.load %arg6[%c0_9, %c0_10] : memref<1x128xf32, #tpu.memory_space<vmem>>, vector<1x128xf32>
    %12 = vector.broadcast %11 : vector<1x128xf32> to vector<16x128xf32>
    %13 = arith.addf %10, %12 : vector<16x128xf32>
    %14 = vector.extract_strided_slice %0 {offsets = [0, 0], sizes = [16, 16], strides = [1, 1]} : vector<16x128xbf16> to vector<16x16xbf16>
    %15 = tpu.concatenate %14, %14, %14, %14, %14, %14, %14, %14 in 1 : vector<16x16xbf16>, vector<16x16xbf16>, vector<16x16xbf16>, vector<16x16xbf16>, vector<16x16xbf16>, vector<16x16xbf16>, vector<16x16xbf16>, vector<16x16xbf16> -> vector<16x128xbf16>
    %16 = arith.mulf %15, %0 : vector<16x128xbf16>
    %c0_11 = arith.constant 0 : index
    %c0_12 = arith.constant 0 : index
    %c0_13 = arith.constant 0 : index
    %17 = vector.load %arg2[%c0_11, %c0_12, %c0_13] : memref<7x128x128xbf16, #tpu.memory_space<vmem>>, vector<1x128x128xbf16>
    %18 = vector.shape_cast %17 : vector<1x128x128xbf16> to vector<128x128xbf16>
    %cst_14 = arith.constant dense<0.000000e+00> : vector<16x128xf32>
    %19 = tpu.matmul %16, %18, %cst_14 {dimension_numbers = #tpu.dot_dimension_numbers<[1], [0], [0], [1], [0, 0, 1, 1], [], []>} : vector<16x128xbf16>, vector<128x128xbf16>, vector<16x128xf32> -> vector<16x128xf32>
    %20 = arith.addf %13, %19 : vector<16x128xf32>
    %21 = vector.extract_strided_slice %0 {offsets = [0, 16], sizes = [16, 16], strides = [1, 1]} : vector<16x128xbf16> to vector<16x16xbf16>
    %22 = tpu.concatenate %21, %21, %21, %21, %21, %21, %21, %21 in 1 : vector<16x16xbf16>, vector<16x16xbf16>, vector<16x16xbf16>, vector<16x16xbf16>, vector<16x16xbf16>, vector<16x16xbf16>, vector<16x16xbf16>, vector<16x16xbf16> -> vector<16x128xbf16>
    %23 = arith.mulf %22, %0 : vector<16x128xbf16>
    %c1 = arith.constant 1 : index
    %c0_15 = arith.constant 0 : index
    %c0_16 = arith.constant 0 : index
    %24 = vector.load %arg2[%c1, %c0_15, %c0_16] : memref<7x128x128xbf16, #tpu.memory_space<vmem>>, vector<1x128x128xbf16>
    %25 = vector.shape_cast %24 : vector<1x128x128xbf16> to vector<128x128xbf16>
    %cst_17 = arith.constant dense<0.000000e+00> : vector<16x128xf32>
    %26 = tpu.matmul %23, %25, %cst_17 {dimension_numbers = #tpu.dot_dimension_numbers<[1], [0], [0], [1], [0, 0, 1, 1], [], []>} : vector<16x128xbf16>, vector<128x128xbf16>, vector<16x128xf32> -> vector<16x128xf32>
    %27 = arith.addf %20, %26 : vector<16x128xf32>
    %28 = vector.extract_strided_slice %0 {offsets = [0, 32], sizes = [16, 16], strides = [1, 1]} : vector<16x128xbf16> to vector<16x16xbf16>
    %29 = tpu.concatenate %28, %28, %28, %28, %28, %28, %28, %28 in 1 : vector<16x16xbf16>, vector<16x16xbf16>, vector<16x16xbf16>, vector<16x16xbf16>, vector<16x16xbf16>, vector<16x16xbf16>, vector<16x16xbf16>, vector<16x16xbf16> -> vector<16x128xbf16>
    %30 = arith.mulf %29, %0 : vector<16x128xbf16>
    %c2 = arith.constant 2 : index
    %c0_18 = arith.constant 0 : index
    %c0_19 = arith.constant 0 : index
    %31 = vector.load %arg2[%c2, %c0_18, %c0_19] : memref<7x128x128xbf16, #tpu.memory_space<vmem>>, vector<1x128x128xbf16>
    %32 = vector.shape_cast %31 : vector<1x128x128xbf16> to vector<128x128xbf16>
    %cst_20 = arith.constant dense<0.000000e+00> : vector<16x128xf32>
    %33 = tpu.matmul %30, %32, %cst_20 {dimension_numbers = #tpu.dot_dimension_numbers<[1], [0], [0], [1], [0, 0, 1, 1], [], []>} : vector<16x128xbf16>, vector<128x128xbf16>, vector<16x128xf32> -> vector<16x128xf32>
    %34 = arith.addf %27, %33 : vector<16x128xf32>
    %35 = vector.extract_strided_slice %0 {offsets = [0, 48], sizes = [16, 16], strides = [1, 1]} : vector<16x128xbf16> to vector<16x16xbf16>
    %36 = tpu.concatenate %35, %35, %35, %35, %35, %35, %35, %35 in 1 : vector<16x16xbf16>, vector<16x16xbf16>, vector<16x16xbf16>, vector<16x16xbf16>, vector<16x16xbf16>, vector<16x16xbf16>, vector<16x16xbf16>, vector<16x16xbf16> -> vector<16x128xbf16>
    %37 = arith.mulf %36, %0 : vector<16x128xbf16>
    %c3 = arith.constant 3 : index
    %c0_21 = arith.constant 0 : index
    %c0_22 = arith.constant 0 : index
    %38 = vector.load %arg2[%c3, %c0_21, %c0_22] : memref<7x128x128xbf16, #tpu.memory_space<vmem>>, vector<1x128x128xbf16>
    %39 = vector.shape_cast %38 : vector<1x128x128xbf16> to vector<128x128xbf16>
    %cst_23 = arith.constant dense<0.000000e+00> : vector<16x128xf32>
    %40 = tpu.matmul %37, %39, %cst_23 {dimension_numbers = #tpu.dot_dimension_numbers<[1], [0], [0], [1], [0, 0, 1, 1], [], []>} : vector<16x128xbf16>, vector<128x128xbf16>, vector<16x128xf32> -> vector<16x128xf32>
    %41 = arith.addf %34, %40 : vector<16x128xf32>
    %42 = vector.extract_strided_slice %0 {offsets = [0, 64], sizes = [16, 16], strides = [1, 1]} : vector<16x128xbf16> to vector<16x16xbf16>
    %43 = tpu.concatenate %42, %42, %42, %42, %42, %42, %42, %42 in 1 : vector<16x16xbf16>, vector<16x16xbf16>, vector<16x16xbf16>, vector<16x16xbf16>, vector<16x16xbf16>, vector<16x16xbf16>, vector<16x16xbf16>, vector<16x16xbf16> -> vector<16x128xbf16>
    %44 = arith.mulf %43, %0 : vector<16x128xbf16>
    %c4 = arith.constant 4 : index
    %c0_24 = arith.constant 0 : index
    %c0_25 = arith.constant 0 : index
    %45 = vector.load %arg2[%c4, %c0_24, %c0_25] : memref<7x128x128xbf16, #tpu.memory_space<vmem>>, vector<1x128x128xbf16>
    %46 = vector.shape_cast %45 : vector<1x128x128xbf16> to vector<128x128xbf16>
    %cst_26 = arith.constant dense<0.000000e+00> : vector<16x128xf32>
    %47 = tpu.matmul %44, %46, %cst_26 {dimension_numbers = #tpu.dot_dimension_numbers<[1], [0], [0], [1], [0, 0, 1, 1], [], []>} : vector<16x128xbf16>, vector<128x128xbf16>, vector<16x128xf32> -> vector<16x128xf32>
    %48 = arith.addf %41, %47 : vector<16x128xf32>
    %49 = vector.extract_strided_slice %0 {offsets = [0, 80], sizes = [16, 16], strides = [1, 1]} : vector<16x128xbf16> to vector<16x16xbf16>
    %50 = tpu.concatenate %49, %49, %49, %49, %49, %49, %49, %49 in 1 : vector<16x16xbf16>, vector<16x16xbf16>, vector<16x16xbf16>, vector<16x16xbf16>, vector<16x16xbf16>, vector<16x16xbf16>, vector<16x16xbf16>, vector<16x16xbf16> -> vector<16x128xbf16>
    %51 = arith.mulf %50, %0 : vector<16x128xbf16>
    %c5 = arith.constant 5 : index
    %c0_27 = arith.constant 0 : index
    %c0_28 = arith.constant 0 : index
    %52 = vector.load %arg2[%c5, %c0_27, %c0_28] : memref<7x128x128xbf16, #tpu.memory_space<vmem>>, vector<1x128x128xbf16>
    %53 = vector.shape_cast %52 : vector<1x128x128xbf16> to vector<128x128xbf16>
    %cst_29 = arith.constant dense<0.000000e+00> : vector<16x128xf32>
    %54 = tpu.matmul %51, %53, %cst_29 {dimension_numbers = #tpu.dot_dimension_numbers<[1], [0], [0], [1], [0, 0, 1, 1], [], []>} : vector<16x128xbf16>, vector<128x128xbf16>, vector<16x128xf32> -> vector<16x128xf32>
    %55 = arith.addf %48, %54 : vector<16x128xf32>
    %56 = vector.extract_strided_slice %0 {offsets = [0, 96], sizes = [16, 16], strides = [1, 1]} : vector<16x128xbf16> to vector<16x16xbf16>
    %57 = tpu.concatenate %56, %56, %56, %56, %56, %56, %56, %56 in 1 : vector<16x16xbf16>, vector<16x16xbf16>, vector<16x16xbf16>, vector<16x16xbf16>, vector<16x16xbf16>, vector<16x16xbf16>, vector<16x16xbf16>, vector<16x16xbf16> -> vector<16x128xbf16>
    %58 = arith.mulf %57, %0 : vector<16x128xbf16>
    %c6 = arith.constant 6 : index
    %c0_30 = arith.constant 0 : index
    %c0_31 = arith.constant 0 : index
    %59 = vector.load %arg2[%c6, %c0_30, %c0_31] : memref<7x128x128xbf16, #tpu.memory_space<vmem>>, vector<1x128x128xbf16>
    %60 = vector.shape_cast %59 : vector<1x128x128xbf16> to vector<128x128xbf16>
    %cst_32 = arith.constant dense<0.000000e+00> : vector<16x128xf32>
    %61 = tpu.matmul %58, %60, %cst_32 {dimension_numbers = #tpu.dot_dimension_numbers<[1], [0], [0], [1], [0, 0, 1, 1], [], []>} : vector<16x128xbf16>, vector<128x128xbf16>, vector<16x128xf32> -> vector<16x128xf32>
    %62 = arith.addf %55, %61 : vector<16x128xf32>
    %63 = arith.truncf %62 : vector<16x128xf32> to vector<16x128xbf16>
    %c0_33 = arith.constant 0 : index
    %c0_34 = arith.constant 0 : index
    %64 = vector.load %arg7[%c0_33, %c0_34] : memref<16x128xbf16, #tpu.memory_space<vmem>>, vector<16x128xbf16>
    tpu.vector_store %arg7[%c0_33, %c0_34], %63 {strides = array<i32>} : memref<16x128xbf16, #tpu.memory_space<vmem>>, vector<16x128xbf16>,
    return
  }
  func.func @transform_0(%arg0: i32) -> (i32, i32) {
    %c0_i32 = arith.constant 0 : i32
    %c0_i32_0 = arith.constant 0 : i32
    return %arg0, %c0_i32 : i32, i32
  }
  func.func @transform_1(%arg0: i32) -> (i32, i32, i32) {
    %c0_i32 = arith.constant 0 : i32
    %c0_i32_0 = arith.constant 0 : i32
    %c0_i32_1 = arith.constant 0 : i32
    %c0_i32_2 = arith.constant 0 : i32
    return %c0_i32, %c0_i32_0, %c0_i32_1 : i32, i32, i32
  }
  func.func @transform_2(%arg0: i32) -> (i32, i32) {
    %c0_i32 = arith.constant 0 : i32
    %c0_i32_0 = arith.constant 0 : i32
    %c0_i32_1 = arith.constant 0 : i32
    return %c0_i32, %c0_i32_0 : i32, i32
  }
  func.func @transform_3(%arg0: i32) -> (i32, i32) {
    %c0_i32 = arith.constant 0 : i32
    %c0_i32_0 = arith.constant 0 : i32
    %c0_i32_1 = arith.constant 0 : i32
    return %c0_i32, %c0_i32_0 : i32, i32
  }
  func.func @transform_4(%arg0: i32) -> (i32, i32) {
    %c0_i32 = arith.constant 0 : i32
    %c0_i32_0 = arith.constant 0 : i32
    %c0_i32_1 = arith.constant 0 : i32
    return %c0_i32, %c0_i32_0 : i32, i32
  }
  func.func @transform_5(%arg0: i32) -> (i32, i32) {
    %c0_i32 = arith.constant 0 : i32
    %c0_i32_0 = arith.constant 0 : i32
    %c0_i32_1 = arith.constant 0 : i32
    return %c0_i32, %c0_i32_0 : i32, i32
  }
  func.func @transform_6(%arg0: i32) -> (i32, i32) {
    %c0_i32 = arith.constant 0 : i32
    %c0_i32_0 = arith.constant 0 : i32
    return %arg0, %c0_i32 : i32, i32
  }
}

</mosaic_0001>

<bundles_post_ra>
// kernel: tpu_custom_call.1
= control target key start
LH: loop header
LB: loop body
LE: loop exit
PB: predicated region body
PF: predicated region fallthrough
CT: control target
= control target key end

     0   :  { %11 = vsyncpa [#allocation3], 0  ;;  %s1720_s0 = inlined_call_operand.hbm [shape: bf16[16,128], index: 0, kind: input, shape index: {}]   ;;  %s1721_s1 = inlined_call_operand.hbm [shape: bf16[7,128,128], index: 1, kind: input, shape index: {}]   ;;  %s1722_s2 = inlined_call_operand.hbm [shape: bf16[128,128], index: 2, kind: input, shape index: {}]   ;;  %s1723_s3 = inlined_call_operand.vmem [shape: f32[1,128], index: 3, kind: input, shape index: {}]   ;;  %s1724_s4 = inlined_call_operand.hbm [shape: bf16[128,128], index: 4, kind: input, shape index: {}]   ;;  %s1725_s5 = inlined_call_operand.vmem [shape: f32[1,128], index: 5, kind: input, shape index: {}]   ;;  %s1726_s6 = inlined_call_operand.hbm [shape: bf16[16,128], index: 6, kind: output, shape index: {}]  }
   0x1   :  { %12 = vsyncpa [#allocation6], 0 }
   0x2   :  { %13 = vsyncpa [#allocation9], 0 }
   0x3   :  { %14 = vsyncpa [#allocation4], 0  ;;  %s32_s23 = sshll.u32 %s1721_s1, 4  ;;  %s1488_s24 = smov [#allocation5]   ;;  %s33_s23 = int_to_ptr.hbm [resolvable:$true] %s32_s23 }
   0x4   :  { %s34_s25 = sshll.u32 %s1488_s24, 4  ;;  %s19_s28 = sshll.u32 %s1720_s0, 4  ;;  %s35_s25 = int_to_ptr.vmem [resolvable:$true] %s34_s25  ;;  %s20_s28 = int_to_ptr.hbm [resolvable:$true] %s19_s28 }
   0x5   :  { %s1489_s29 = smov 64   ;;  %s1490_s30 = smov 4  }
   0x6   :  { %40 = dma.hbm_to_vmem [thread:$0]  %s33_s23, 7168, %s35_s25, [#allocation6], %s1489_s29, %s1489_s29, %s1490_s30  }
   0x7   :  { %s1491_s7 = smov [#allocation2]   ;;  %s45_s1 = sshll.u32 %s1722_s2, 4  ;;  %s46_s1 = int_to_ptr.hbm [resolvable:$true] %s45_s1 }
   0x8   :  { %s21_s8 = sshll.u32 %s1491_s7, 4  ;;  %s60_s12 = sshll.u32 %s1724_s4, 4  ;;  %s22_s8 = int_to_ptr.vmem [resolvable:$true] %s21_s8  ;;  %s61_s12 = int_to_ptr.hbm [resolvable:$true] %s60_s12 }
   0x9   :  { %27 = dma.hbm_to_vmem [thread:$0]  %s20_s28, 128, %s22_s8, [#allocation3], %s1489_s29, %s1489_s29, %s1490_s30  }
   0xa   :  { %s1492_s13 = smov [#allocation7]   ;;  %s1493_s15 = smov [#allocation8]  }
   0xb   :  { %s47_s14 = sshll.u32 %s1492_s13, 4  ;;  %s62_s2 = sshll.u32 %s1493_s15, 4  ;;  %s48_s14 = int_to_ptr.vmem [resolvable:$true] %s47_s14  ;;  %s63_s2 = int_to_ptr.vmem [resolvable:$true] %s62_s2 }
   0xc   :  { %53 = dma.hbm_to_vmem [thread:$0]  %s46_s1, 1024, %s48_s14, [#allocation6], %s1489_s29, %s1489_s29, %s1490_s30  }
   0xd   :  { %68 = dma.hbm_to_vmem [thread:$0]  %s61_s12, 1024, %s63_s2, [#allocation9], %s1489_s29, %s1489_s29, %s1490_s30  }
   0xe   :  { %1480 = dma.done.wait [#allocation3], 128  }
   0xf   :  { %1481 = vsyncadd [#allocation3], 4294967168 }
  0x10   :  { %1482 = dma.done.wait [#allocation6], 8192  }
  0x11   :  { %1483 = vsyncadd [#allocation6], 4294959104 }
  0x12   :  { %1484 = dma.done.wait [#allocation9], 1024  }
  0x13   :  { %1485 = vsyncadd [#allocation9], 4294966272  ;;  %v1275_v0 = vld [vmem:[#allocation7 + $0x38] sm:$0xff]  ;;  %s1494_s4 = smov 16   ;;  %v1274_v2 = vld [vmem:[#allocation7 + $0x30] sm:$0xff]  ;;  %s1495_s16 = smov 48  }
  0x14   :  { %v1560_v1 = vld [vmem:[#allocation2] sm:$0xff]  ;;  %163 = vmatpush.bf16.msra.mxu0 %v1275_v0  ;;  %v1298_v5 = vld [vmem:[#allocation5 + $0x70] sm:$0xff]  ;;  %v1273_v7 = vld [vmem:[#allocation7 + $0x28] sm:$0xff]  ;;  %s1496_s17 = smov 32   ;;  %s1497_s18 = smov 112   ;;  %vm276_vm0 = vcmask 130048  }
  0x15   :  { %262 = vrot.lane.b32.xlu0 %v1560_v1, %s1494_s4  ;;  %266 = vrot.lane.b32.xlu1 %v1560_v1, %s1495_s16  ;;  %v1299_v3 = vld [vmem:[#allocation5 + $0x78] sm:$0xff]  ;;  %v1290_v6 = vld [vmem:[#allocation5 + $0x30] sm:$0xff]  ;;  %v1297_v8 = vld [vmem:[#allocation5 + $0x68] sm:$0xff]  ;;  %s1498_s19 = smov 80   ;;  %s1499_s20 = smov 96   ;;  %vm280_vm1 = vcmask 261120  }
  0x16   :  { %268 = vrot.lane.b32.xlu2 %v1560_v1, %s1489_s29  ;;  %v1291_v4 = vld [vmem:[#allocation5 + $0x38] sm:$0xff]  ;;  %464 = vmatpush.bf16.msra.mxu3 %v1299_v3  ;;  %v1289_v9 = vld [vmem:[#allocation5 + $0x28] sm:$0xff]  ;;  %v1272_v10 = vld [vmem:[#allocation7 + $0x20] sm:$0xff]  ;;  %vm283_vm2 = vcmask 392192   ;;  %vm286_vm3 = vcmask 523264   ;;  %vm289_vm4 = vcmask 654336  }
  0x17   :  { %370 = vmatpush.bf16.msra.mxu2 %v1291_v4  ;;  %v1296_v11 = vld [vmem:[#allocation5 + $0x60] sm:$0xff]  ;;  %v1271_v13 = vld [vmem:[#allocation7 + $0x18] sm:$0xff]  ;;  %v1270_v16 = vld [vmem:[#allocation7 + $0x10] sm:$0xff]  ;;  %vm292_vm5 = vcmask 785408   ;;  %vm295_vm6 = vcmask 916480   ;;  %s960_s27 = sshll.u32 %s1726_s6, 4  ;;  %s961_s27 = int_to_ptr.hbm [resolvable:$true] %s960_s27 }
  0x18   :  { %164 = vmatpush.bf16.msra.mxu0 %v1274_v2  ;;  %v1288_v12 = vld [vmem:[#allocation5 + $0x20] sm:$0xff]  ;;  %v1295_v14 = vld [vmem:[#allocation5 + $0x58] sm:$0xff]  ;;  %v1294_v17 = vld [vmem:[#allocation5 + $0x50] sm:$0xff] }
  0x19   :  { %v1287_v15 = vld [vmem:[#allocation5 + $0x18] sm:$0xff]  ;;  %v1269_v18 = vld [vmem:[#allocation7 + $0x8] sm:$0xff]  ;;  %v1268_v19 = vld [vmem:[#allocation7] sm:$0xff] }
  0x1a   :  { %465 = vmatpush.bf16.msra.mxu3 %v1298_v5  ;;  %v1307_v20 = vld [vmem:[#allocation5 + $0xb8] sm:$0xff]  ;;  %v1306_v21 = vld [vmem:[#allocation5 + $0xb0] sm:$0xff]  ;;  %v1305_v22 = vld [vmem:[#allocation5 + $0xa8] sm:$0xff] }
  0x1b   :  { %371 = vmatpush.bf16.msra.mxu2 %v1290_v6  ;;  %v1304_v23 = vld [vmem:[#allocation5 + $0xa0] sm:$0xff]  ;;  %v1286_v24 = vld [vmem:[#allocation5 + $0x10] sm:$0xff]  ;;  %v1303_v25 = vld [vmem:[#allocation5 + $0x98] sm:$0xff] }
  0x1c   :  { %165 = vmatpush.bf16.msra.mxu0 %v1273_v7  ;;  %v1293_v26 = vld [vmem:[#allocation5 + $0x48] sm:$0xff]  ;;  %v1302_v28 = vld [vmem:[#allocation5 + $0x90] sm:$0xff]  ;;  %v1292_v29 = vld [vmem:[#allocation5 + $0x40] sm:$0xff] }
  0x1d   :  { %264 = vrot.lane.b32.xlu0 %v1560_v1, %s1496_s17  ;;  %274 = vrot.lane.b32.xlu1 %v1560_v1, %s1497_s18  ;;  %v1285_v27 = vld [vmem:[#allocation5 + $0x8] sm:$0xff]  ;;  %v1284_v30 = vld [vmem:[#allocation5] sm:$0xff]  ;;  %v1331_v31 = vld [vmem:[#allocation5 + $0x178] sm:$0xff] }
  0x1e   :  { %270 = vrot.lane.b32.xlu2 %v1560_v1, %s1498_s19  ;;  %466 = vmatpush.bf16.msra.mxu3 %v1297_v8  ;;  %v1301_v32 = vld [vmem:[#allocation5 + $0x88] sm:$0xff]  ;;  %v1323_v33 = vld [vmem:[#allocation5 + $0x138] sm:$0xff]  ;;  %v1330_v35 = vld [vmem:[#allocation5 + $0x170] sm:$0xff] }
  0x1f   :  { %372 = vmatpush.bf16.msra.mxu2 %v1289_v9  ;;  %v1283_v34 = vld [vmem:[#allocation8 + $0x38] sm:$0xff]  ;;  %v1300_v36 = vld [vmem:[#allocation5 + $0x80] sm:$0xff]  ;;  %v1322_v37 = vld [vmem:[#allocation5 + $0x130] sm:$0xff] }
  0x20   :  { %166 = vmatpush.bf16.msra.mxu0 %v1272_v10  ;;  %v1339_v38 = vld [vmem:[#allocation5 + $0x1b8] sm:$0xff]  ;;  %248 = vmatpush.bf16.msra.mxu1 %v1283_v34  ;;  %v1282_v39 = vld [vmem:[#allocation8 + $0x30] sm:$0xff]  ;;  %v1329_v40 = vld [vmem:[#allocation5 + $0x168] sm:$0xff] }
  0x21   :  { %v1321_v41 = vld [vmem:[#allocation5 + $0x128] sm:$0xff]  ;;  %v1338_v42 = vld [vmem:[#allocation5 + $0x1b0] sm:$0xff]  ;;  %v1328_v44 = vld [vmem:[#allocation5 + $0x160] sm:$0xff] }
  0x22   :  { %467 = vmatpush.bf16.msra.mxu3 %v1296_v11  ;;  %v1281_v43 = vld [vmem:[#allocation8 + $0x28] sm:$0xff]  ;;  %v1320_v45 = vld [vmem:[#allocation5 + $0x120] sm:$0xff]  ;;  %v1327_v48 = vld [vmem:[#allocation5 + $0x158] sm:$0xff] }
  0x23   :  { %373 = vmatpush.bf16.msra.mxu2 %v1288_v12  ;;  %v1337_v46 = vld [vmem:[#allocation5 + $0x1a8] sm:$0xff]  ;;  %v1280_v47 = vld [vmem:[#allocation8 + $0x20] sm:$0xff]  ;;  %v1319_v49 = vld [vmem:[#allocation5 + $0x118] sm:$0xff] }
  0x24   :  { %167 = vmatpush.bf16.msra.mxu0 %v1271_v13  ;;  %249 = vmatpush.bf16.msra.mxu1 %v1282_v39  ;;  %v1336_v50 = vld [vmem:[#allocation5 + $0x1a0] sm:$0xff]  ;;  %v1279_v51 = vld [vmem:[#allocation8 + $0x18] sm:$0xff]  ;;  %v1326_v52 = vld [vmem:[#allocation5 + $0x150] sm:$0xff] }
  0x25   :  { %272 = vrot.lane.b32.xlu0 %v1560_v1, %s1499_s20  ;;  %v1318_v53 = vld [vmem:[#allocation5 + $0x110] sm:$0xff]  ;;  %v1335_v55 = vld [vmem:[#allocation5 + $0x198] sm:$0xff]  ;;  %v1325_v57 = vld [vmem:[#allocation5 + $0x148] sm:$0xff] }
  0x26   :  { %468 = vmatpush.bf16.msra.mxu3 %v1295_v14  ;;  %v1278_v56 = vld [vmem:[#allocation8 + $0x10] sm:$0xff]  ;;  %v1317_v59 = vld [vmem:[#allocation5 + $0x108] sm:$0xff]  ;;  %v1324_v63 = vld [vmem:[#allocation5 + $0x140] sm:$0xff] }
  0x27   :  { %374 = vmatpush.bf16.msra.mxu2 %v1287_v15  ;;  %v1334_v60 = vld [vmem:[#allocation5 + $0x190] sm:$0xff]  ;;  %v1277_v62 = vld [vmem:[#allocation8 + $0x8] sm:$0xff]  ;;  %v1316_v0 = vld [vmem:[#allocation5 + $0x100] sm:$0xff] }
  0x28   :  { %168 = vmatpush.bf16.msra.mxu0 %v1270_v16  ;;  %250 = vmatpush.bf16.msra.mxu1 %v1281_v43  ;;  %v1333_v3 = vld [vmem:[#allocation5 + $0x188] sm:$0xff]  ;;  %v1276_v8 = vld [vmem:[#allocation8] sm:$0xff]  ;;  %v1315_v12 = vld [vmem:[#allocation5 + $0xf8] sm:$0xff] }
  0x29   :  { %v1332_v14 = vld [vmem:[#allocation5 + $0x180] sm:$0xff]  ;;  %v87_v16 = vld [vmem:[#allocation2] sm:$0xff]  }
  0x2a   :  { %469 = vmatpush.bf16.msra.mxu3 %v1294_v17  ;;  %v1635_v34 = vunpack.c.h.bf16 %v87_v16 }
  0x2b   :  { %375 = vmatpush.bf16.msra.mxu2 %v1286_v24 }
  0x2c   :  { %169 = vmatpush.bf16.msra.mxu0 %v1269_v18  ;;  %251 = vmatpush.bf16.msra.mxu1 %v1280_v47  ;;  %v1314_v18 = vld [vmem:[#allocation5 + $0xf0] sm:$0xff] }
  0x2e   :  { %470 = vmatpush.bf16.msra.mxu3 %v1293_v26 }
  0x2f   :  { %376 = vmatpush.bf16.msra.mxu2 %v1285_v27 }
  0x30   :  { %170 = vmatpush.bf16.msra.mxu0 %v1268_v19  ;;  %252 = vmatpush.bf16.msra.mxu1 %v1279_v51 }
  0x32   :  { %471 = vmatpush.bf16.msra.mxu3 %v1292_v29 }
  0x33   :  { %171 = vmatmul.bf16.vlgmr.msra.gmra.mxu0 %v1560_v1  ;;  %377 = vmatpush.bf16.msra.mxu2 %v1284_v30 }
  0x34   :  { %558 = vmatpush.bf16.msrb.mxu0 %v1307_v20  ;;  %253 = vmatpush.bf16.msra.mxu1 %v1278_v56 }
  0x36   :  { %840 = vmatpush.bf16.msrb.mxu3 %v1331_v31 }
  0x37   :  { %746 = vmatpush.bf16.msrb.mxu2 %v1323_v33 }
  0x38   :  { %559 = vmatpush.bf16.msrb.mxu0 %v1306_v21  ;;  %254 = vmatpush.bf16.msra.mxu1 %v1277_v62 }
  0x3a   :  { %841 = vmatpush.bf16.msrb.mxu3 %v1330_v35 }
  0x3b   :  { %747 = vmatpush.bf16.msrb.mxu2 %v1322_v37  ;;  %v1313_v37 = vld [vmem:[#allocation5 + $0xe8] sm:$0xff] }
  0x3c   :  { %560 = vmatpush.bf16.msrb.mxu0 %v1305_v22  ;;  %255 = vmatpush.bf16.msra.mxu1 %v1276_v8 }
  0x3e   :  { %842 = vmatpush.bf16.msrb.mxu3 %v1329_v40 }
  0x3f   :  { %748 = vmatpush.bf16.msrb.mxu2 %v1321_v41 }
  0x40   :  { %561 = vmatpush.bf16.msrb.mxu0 %v1304_v23  ;;  %652 = vmatpush.bf16.msrb.mxu1 %v1315_v12  ;;  %v1310_v12 = vld [vmem:[#allocation5 + $0xd0] sm:$0xff] }
  0x42   :  { %843 = vmatpush.bf16.msrb.mxu3 %v1328_v44 }
  0x43   :  { %749 = vmatpush.bf16.msrb.mxu2 %v1320_v45 }
  0x44   :  { %562 = vmatpush.bf16.msrb.mxu0 %v1303_v25  ;;  %v1616_v25 = vunpack.c.l.bf16 %v87_v16  ;;  %653 = vmatpush.bf16.msrb.mxu1 %v1314_v18 }
  0x46   :  { %844 = vmatpush.bf16.msrb.mxu3 %v1327_v48 }
  0x47   :  { %750 = vmatpush.bf16.msrb.mxu2 %v1319_v49 }
  0x48   :  { %563 = vmatpush.bf16.msrb.mxu0 %v1302_v28  ;;  %654 = vmatpush.bf16.msrb.mxu1 %v1313_v37 }
  0x4a   :  { %845 = vmatpush.bf16.msrb.mxu3 %v1326_v52 }
  0x4b   :  { %751 = vmatpush.bf16.msrb.mxu2 %v1318_v53 }
  0x4c   :  { %564 = vmatpush.bf16.msrb.mxu0 %v1301_v32 }
  0x4e   :  { %846 = vmatpush.bf16.msrb.mxu3 %v1325_v57 }
  0x4f   :  { %752 = vmatpush.bf16.msrb.mxu2 %v1317_v59 }
  0x50   :  { %565 = vmatpush.bf16.msrb.mxu0 %v1300_v36 }
  0x52   :  { %847 = vmatpush.bf16.msrb.mxu3 %v1324_v63  ;;  %v1311_v63 = vld [vmem:[#allocation5 + $0xd8] sm:$0xff] }
  0x53   :  { %753 = vmatpush.bf16.msrb.mxu2 %v1316_v0 }
  0x54   :  { %934 = vmatpush.bf16.msra.mxu0 %v1339_v38 }
  0x58   :  { %935 = vmatpush.bf16.msra.mxu0 %v1338_v42 }
  0x5c   :  { %936 = vmatpush.bf16.msra.mxu0 %v1337_v46  ;;  %v1312_v46 = vld [vmem:[#allocation5 + $0xe0] sm:$0xff] }
  0x5d   :  { %655 = vmatpush.bf16.msrb.mxu1 %v1312_v46 }
  0x60   :  { %937 = vmatpush.bf16.msra.mxu0 %v1336_v50 }
  0x61   :  { %656 = vmatpush.bf16.msrb.mxu1 %v1311_v63 }
  0x64   :  { %938 = vmatpush.bf16.msra.mxu0 %v1335_v55 }
  0x65   :  { %657 = vmatpush.bf16.msrb.mxu1 %v1310_v12 }
  0x68   :  { %939 = vmatpush.bf16.msra.mxu0 %v1334_v60 }
  0x6c   :  { %940 = vmatpush.bf16.msra.mxu0 %v1333_v3 }
  0x70   :  { %v1575_v61 = vpop.permute.xlu2 %268  ;;  %941 = vmatpush.bf16.msra.mxu0 %v1332_v14 }
  0x78   :  { %v1598_v15 = vpop.permute.xlu2 %270 }
  0x79   :  { %v668_v19 = vsel %vm276_vm0, %v1575_v61, %v1598_v15 }
  0x87   :  { %v1571_v54 = vpop.permute.xlu0 %262  ;;  %v1573_v58 = vpop.permute.xlu1 %266 }
  0x88   :  { %v279_v2 = vsel %vm276_vm0, %v1560_v1, %v1571_v54  ;;  %v762_v10 = vsel %vm276_vm0, %v1573_v58, %v1575_v61 }
  0x89   :  { %v763_v20 = vsel %vm280_vm1, %v762_v10, %v1598_v15 }
  0x8f   :  { %v1580_v4 = vpop.permute.xlu0 %264  ;;  %v1584_v6 = vpop.permute.xlu1 %274 }
  0x90   :  { %v282_v5 = vsel %vm280_vm1, %v279_v2, %v1580_v4  ;;  %v386_v7 = vsel %vm276_vm0, %v1584_v6, %v1560_v1  ;;  %v856_v23 = vsel %vm276_vm0, %v1580_v4, %v1573_v58 }
  0x91   :  { %v387_v9 = vsel %vm280_vm1, %v386_v7, %v1571_v54  ;;  %v285_v11 = vsel %vm283_vm2, %v282_v5, %v1573_v58  ;;  %v857_v31 = vsel %vm280_vm1, %v856_v23, %v1575_v61 }
  0x92   :  { %v388_v13 = vsel %vm283_vm2, %v387_v9, %v1580_v4  ;;  %v288_v22 = vsel %vm286_vm3, %v285_v11, %v1575_v61  ;;  %v858_v42 = vsel %vm283_vm2, %v857_v31, %v1598_v15 }
  0x93   :  { %v389_v17 = vsel %vm286_vm3, %v388_v13, %v1573_v58  ;;  %v291_v30 = vsel %vm289_vm4, %v288_v22, %v1598_v15 }
  0x94   :  { %v390_v21 = vsel %vm289_vm4, %v389_v17, %v1575_v61 }
  0x95   :  { %v391_v26 = vsel %vm292_vm5, %v390_v21, %v1598_v15 }
  0x97   :  { %v1614_v24 = vpop.permute.xlu0 %272 }
  0x98   :  { %v480_v27 = vsel %vm276_vm0, %v1614_v24, %v1584_v6  ;;  %v669_v28 = vsel %vm280_vm1, %v668_v19, %v1614_v24  ;;  %v764_v29 = vsel %vm283_vm2, %v763_v20, %v1614_v24  ;;  %v392_v36 = vsel %vm295_vm6, %v391_v26, %v1614_v24  ;;  %v1309_v19 = vld [vmem:[#allocation5 + $0xc8] sm:$0xff] }
  0x99   :  { %v481_v32 = vsel %vm280_vm1, %v480_v27, %v1560_v1  ;;  %v670_v33 = vsel %vm283_vm2, %v669_v28, %v1584_v6  ;;  %v765_v38 = vsel %vm286_vm3, %v764_v29, %v1584_v6  ;;  %v394_v39 = vunpack.c.l.bf16 %v392_v36  ;;  %658 = vmatpush.bf16.msrb.mxu1 %v1309_v19  ;;  %v1308_v27 = vld [vmem:[#allocation5 + $0xc0] sm:$0xff] }
  0x9a   :  { %v482_v35 = vsel %vm283_vm2, %v481_v32, %v1571_v54  ;;  %v395_v40 = vunpack.c.h.bf16 %v392_v36  ;;  %v294_v41 = vsel %vm292_vm5, %v291_v30, %v1614_v24  ;;  %v671_v45 = vsel %vm286_vm3, %v670_v33, %v1560_v1 }
  0x9b   :  { %v297_v43 = vsel %vm295_vm6, %v294_v41, %v1584_v6  ;;  %v483_v44 = vsel %vm286_vm3, %v482_v35, %v1580_v4  ;;  %v396_v47 = vmul.f32 %v394_v39, %v1616_v25  ;;  %v766_v52 = vsel %vm289_vm4, %v765_v38, %v1560_v1 }
  0x9c   :  { %v397_v48 = vmul.f32 %v395_v40, %v1635_v34  ;;  %v299_v49 = vunpack.c.l.bf16 %v297_v43  ;;  %v300_v50 = vunpack.c.h.bf16 %v297_v43  ;;  %v484_v51 = vsel %vm289_vm4, %v483_v44, %v1573_v58  ;;  %v1358_v40 = vld [vmem:[%s1723_s3] ss:$0 sm:$0xff] }
  0x9d   :  { %v485_v57 = vsel %vm292_vm5, %v484_v51, %v1575_v61  ;;  %v859_v59 = vsel %vm286_vm3, %v858_v42, %v1614_v24  ;;  %v672_v62 = vsel %vm289_vm4, %v671_v45, %v1571_v54  ;;  %v767_v5 = vsel %vm292_vm5, %v766_v52, %v1571_v54  ;;  %659 = vmatpush.bf16.msrb.mxu1 %v1308_v27 }
  0x9e   :  { %v398_v53 = vpack.c.bf16 %v397_v48, %v396_v47  ;;  %v303_v55 = vmul.f32 %v1616_v25, %v299_v49  ;;  %v304_v56 = vmul.f32 %v1635_v34, %v300_v50  ;;  %v486_v60 = vsel %vm295_vm6, %v485_v57, %v1598_v15  ;;  %v1359_v57 = vld [vmem:[%s1725_s5] ss:$0 sm:$0xff]  ;;  %s1500_s5 = smov [#allocation10]  }
  0x9f   :  { %v488_v2 = vunpack.c.l.bf16 %v486_v60  ;;  %v489_v3 = vunpack.c.h.bf16 %v486_v60  ;;  %v673_v9 = vsel %vm292_vm5, %v672_v62, %v1580_v4  ;;  %v860_v10 = vsel %vm289_vm4, %v859_v59, %v1584_v6  ;;  %s958_s24 = sshll.u32 %s1500_s5, 4  ;;  %s959_s24 = int_to_ptr.vmem [resolvable:$true] %s958_s24 }
  0xa0   :  { %472 = vmatmul.bf16.vlgmr.msra.gmra.mxu3 %v398_v53  ;;  %v305_v0 = vpack.c.bf16 %v304_v56, %v303_v55  ;;  %v768_v11 = vsel %vm295_vm6, %v767_v5, %v1580_v4  ;;  %v674_v14 = vsel %vm295_vm6, %v673_v9, %v1573_v58  ;;  %v861_v18 = vsel %vm292_vm5, %v860_v10, %v1560_v1 }
  0xa1   :  { %v490_v7 = vmul.f32 %v488_v2, %v1616_v25  ;;  %v491_v8 = vmul.f32 %v489_v3, %v1635_v34  ;;  %v770_v16 = vunpack.c.l.bf16 %v768_v11  ;;  %v771_v17 = vunpack.c.h.bf16 %v768_v11 }
  0xa2   :  { %378 = vmatmul.bf16.vlgmr.msra.gmra.mxu2 %v305_v0  ;;  %v676_v20 = vunpack.c.l.bf16 %v674_v14  ;;  %v677_v21 = vunpack.c.h.bf16 %v674_v14  ;;  %v862_v22 = vsel %vm295_vm6, %v861_v18, %v1571_v54  ;;  %v574_v33 = vsel %vm276_vm0, %v1598_v15, %v1614_v24 }
  0xa3   :  { %v492_v13 = vpack.c.bf16 %v491_v8, %v490_v7  ;;  %v772_v23 = vmul.f32 %v770_v16, %v1616_v25  ;;  %v773_v26 = vmul.f32 %v771_v17, %v1635_v34  ;;  %v864_v30 = vunpack.c.l.bf16 %v862_v22 }
  0xa4   :  { %v678_v28 = vmul.f32 %v676_v20, %v1616_v25  ;;  %v679_v29 = vmul.f32 %v677_v21, %v1635_v34  ;;  %v865_v31 = vunpack.c.h.bf16 %v862_v22  ;;  %v575_v39 = vsel %vm280_vm1, %v574_v33, %v1584_v6 }
  0xa5   :  { %566 = vmatmul.bf16.vlgmr.msrb.gmra.mxu0 %v492_v13  ;;  %v774_v32 = vpack.c.bf16 %v773_v26, %v772_v23  ;;  %v866_v37 = vmul.f32 %v864_v30, %v1616_v25  ;;  %v576_v42 = vsel %vm283_vm2, %v575_v39, %v1560_v1 }
  0xa6   :  { %v680_v35 = vpack.c.bf16 %v679_v29, %v678_v28  ;;  %v867_v38 = vmul.f32 %v865_v31, %v1635_v34  ;;  %v577_v44 = vsel %vm286_vm3, %v576_v42, %v1571_v54 }
  0xa7   :  { %v578_v6 = vsel %vm289_vm4, %v577_v44, %v1580_v4 }
  0xa8   :  { %v868_v41 = vpack.c.bf16 %v867_v38, %v866_v37  ;;  %v579_v48 = vsel %vm292_vm5, %v578_v6, %v1573_v58 }
  0xa9   :  { %v580_v1 = vsel %vm295_vm6, %v579_v48, %v1575_v61 }
  0xaa   :  { %v582_v49 = vunpack.c.l.bf16 %v580_v1  ;;  %v583_v50 = vunpack.c.h.bf16 %v580_v1 }
  0xac   :  { %v584_v51 = vmul.f32 %v582_v49, %v1616_v25  ;;  %v585_v52 = vmul.f32 %v583_v50, %v1635_v34 }
  0xae   :  { %v586_v54 = vpack.c.bf16 %v585_v52, %v584_v51 }
  0xb0   :  { %848 = vmatmul.bf16.vlgmr.msrb.gmra.mxu3 %v774_v32  ;;  %v172_v36 = vpop.f32.mrf.mxu0 }
  0xb1   :  { %v173_v15 = vadd.f32 %v1358_v40, %v172_v36 }
  0xb2   :  { %754 = vmatmul.bf16.vlgmr.msrb.gmra.mxu2 %v680_v35 }
  0xb3   :  { %v177_v45 = vmax.f32 %v173_v15, 0.0 }
  0xb5   :  { %942 = vmatmul.bf16.vlgmr.msra.gmra.mxu0 %v868_v41 }
  0xb8   :  { %v174_v24 = vpop.f32.mrf.mxu0 }
  0xb9   :  { %v175_v43 = vadd.f32 %v1358_v40, %v174_v24 }
  0xbb   :  { %v178_v46 = vmax.f32 %v175_v43, 0.0 }
  0xbd   :  { %v179_v47 = vpack.c.bf16 %v178_v46, %v177_v45 }
  0xbf   :  { %256 = vmatmul.bf16.vlgmr.msra.gmra.mxu1 %v179_v47 }
  0xcf   :  { %660 = vmatmul.bf16.vlgmr.msrb.gmra.mxu1 %v586_v54 }
 0x122   :  { %v567_v56 = vpop.f32.mrf.mxu0 }
 0x123   :  { %v473_v55 = vpop.f32.mrf.mxu3 }
 0x125   :  { %v379_v53 = vpop.f32.mrf.mxu2 }
 0x12a   :  { %v569_v63 = vpop.f32.mrf.mxu0 }
 0x12b   :  { %v475_v60 = vpop.f32.mrf.mxu3 }
 0x12d   :  { %v381_v59 = vpop.f32.mrf.mxu2 }
 0x132   :  { %v943_v10 = vpop.f32.mrf.mxu0 }
 0x133   :  { %v849_v7 = vpop.f32.mrf.mxu3 }
 0x135   :  { %v755_v34 = vpop.f32.mrf.mxu2 }
 0x13a   :  { %v945_v21 = vpop.f32.mrf.mxu0 }
 0x13b   :  { %v851_v19 = vpop.f32.mrf.mxu3 }
 0x13c   :  { %v257_v4 = vpop.f32.mrf.mxu1 }
 0x13d   :  { %v258_v58 = vadd.f32 %v1359_v57, %v257_v4  ;;  %v757_v16 = vpop.f32.mrf.mxu2 }
 0x13f   :  { %v384_v62 = vadd.f32 %v379_v53, %v258_v58 }
 0x141   :  { %v478_v25 = vadd.f32 %v473_v55, %v384_v62 }
 0x143   :  { %v572_v5 = vadd.f32 %v567_v56, %v478_v25 }
 0x144   :  { %v259_v61 = vpop.f32.mrf.mxu1 }
 0x145   :  { %v260_v0 = vadd.f32 %v1359_v57, %v259_v61 }
 0x147   :  { %v385_v2 = vadd.f32 %v381_v59, %v260_v0 }
 0x149   :  { %v479_v9 = vadd.f32 %v475_v60, %v385_v2 }
 0x14b   :  { %v573_v12 = vadd.f32 %v569_v63, %v479_v9 }
 0x14c   :  { %v661_v3 = vpop.f32.mrf.mxu1 }
 0x14d   :  { %v666_v8 = vadd.f32 %v661_v3, %v572_v5 }
 0x14f   :  { %v760_v11 = vadd.f32 %v755_v34, %v666_v8 }
 0x151   :  { %v854_v17 = vadd.f32 %v849_v7, %v760_v11 }
 0x153   :  { %v948_v22 = vadd.f32 %v943_v10, %v854_v17 }
 0x154   :  { %v663_v13 = vpop.f32.mrf.mxu1 }
 0x155   :  { %v667_v14 = vadd.f32 %v663_v13, %v573_v12 }
 0x157   :  { %v761_v18 = vadd.f32 %v757_v16, %v667_v14 }
 0x159   :  { %v855_v20 = vadd.f32 %v851_v19, %v761_v18 }
 0x15b   :  { %v949_v23 = vadd.f32 %v945_v21, %v855_v20 }
 0x15d   :  { %v1343_v26 = vpack.c.bf16 %v949_v23, %v948_v22 }
 0x15f   :  { %1344 = vst [vmem:[#allocation10] sm:$0xff] %v1343_v26  }
 0x160   :  { %966 = dma.vmem_to_hbm [thread:$0]  %s959_s24, 128, %s961_s27, [#allocation4], %s1489_s29, %s1489_s29, %s1490_s30  }
 0x161   :  { %1486 = dma.done.wait [#allocation4], 128  }
 0x162   :  { %1487 = vsyncadd [#allocation4], 4294967168 }
 0x163   :  { %971 = vsyncpa [#allocation3], 1 }
 0x164   :  { %972 = vsyncpa [#allocation6], 1 }
 0x165   :  { %973 = vsyncpa [#allocation9], 1 }
 0x166   :  { %974 = vsyncpa [#allocation4], 1 }

</bundles_post_ra>
